<compile_context>
chip_gen: v7x
topology: tpu7x:2x2x1
jax: 0.10.0
libtpu: 0.0.40
codegen_flags: <defaults>
</compile_context>

<pallas_src>
import functools

import jax
import jax.numpy as jnp
from jax.experimental import pallas as pl
from jax.experimental.pallas import tpu as pltpu


def _exp_clamp_kernel(x_ref, o_ref, *, max_light):
    x = x_ref[...]
    # exp(min(x, max_light)); min is VPU work, exp goes to the EUP slot.
    o_ref[...] = jnp.exp(jnp.minimum(x, jnp.asarray(max_light, x.dtype)))


def _round_up(v, m):
    return ((v + m - 1) // m) * m


def exp_activation(x, max_light=5.0, *, block_rows=2048, vmem_limit_bytes=None,
                   donate_input=False):
    """Pallas equivalent of torch.exp(torch.clamp(x, max=max_light)).

    NOTE: max_light is assumed to be a static Python scalar (hyperparameter of
    the module).  For a traced max_light it would have to be passed as an SMEM
    scalar instead of being baked in via functools.partial.
    """
    orig_shape = x.shape
    dtype = x.dtype
    itemsize = jnp.dtype(dtype).itemsize
    lanes = 128
    # Minimum second-minor tile is dtype dependent: 8 (32-bit), 16 (16-bit),
    # 32 (8-bit) -- sub-32-bit dtypes pack along sublanes.
    sublane_mult = {4: 8, 2: 16, 1: 32}.get(itemsize, 8)

    n = x.size
    if n == 0:
        return x

    rows = pl.cdiv(n, lanes)
    rows_aligned = _round_up(rows, sublane_mult)

    # Dtype-aware block sizing: round the requested block to the sublane
    # multiple, and never make it bigger than the (aligned) input needs.
    block_rows = max(sublane_mult, (block_rows // sublane_mult) * sublane_mult)
    block_rows = min(block_rows, rows_aligned)

    num_blocks = pl.cdiv(rows, block_rows)
    # v7x megacore: for mid-sized inputs that would collapse to a single block,
    # split into >= 2 grid steps so the "parallel" axis can use both cores.
    if num_blocks == 1 and rows * lanes * itemsize >= (1 << 20) and rows_aligned >= 2 * sublane_mult:
        block_rows = _round_up((rows + 1) // 2, sublane_mult)
        num_blocks = pl.cdiv(rows, block_rows)

    block_bytes = block_rows * lanes * itemsize
    if vmem_limit_bytes is None:
        # Double-buffered in + out = 4 * block_bytes, plus headroom; keep it
        # comfortably under v7x's 64 MiB physical VMEM.
        vmem_limit_bytes = min(max(32 << 20, 4 * block_bytes + (4 << 20)), 48 << 20)

    fast_path = (n == rows * lanes)
    if fast_path:
        # Zero-copy reshape to a lane-dense 2D slab; partial last block (if
        # rows % block_rows != 0) is handled by Pallas boundary masking.
        x2d = x.reshape(rows, lanes)
        padded_rows = rows
    else:
        # Ragged tail: pad the flat tensor up to a whole number of aligned
        # blocks (slow path; only hit when x.size % 128 != 0).
        padded_rows = _round_up(rows, block_rows)
        x_flat = jnp.ravel(x)
        # Pad with 0.0: exp(min(0, max_light)) is finite; padded region dropped.
        x_flat = jnp.pad(x_flat, (0, padded_rows * lanes - n))
        x2d = x_flat.reshape(padded_rows, lanes)
        num_blocks = padded_rows // block_rows

    grid = (num_blocks,)

    kwargs = {}
    if donate_input:
        # Only safe if the caller no longer needs x.
        kwargs["input_output_aliases"] = {0: 0}

    out2d = pl.pallas_call(
        functools.partial(_exp_clamp_kernel, max_light=float(max_light)),
        out_shape=jax.ShapeDtypeStruct((padded_rows, lanes), dtype),
        grid_spec=pltpu.PrefetchScalarGridSpec(
            num_scalar_prefetch=0,
            grid=grid,
            in_specs=[pl.BlockSpec((block_rows, lanes), lambda i: (i, 0))],
            out_specs=pl.BlockSpec((block_rows, lanes), lambda i: (i, 0)),
        ),
        compiler_params=pltpu.CompilerParams(
            dimension_semantics=("parallel",),
            vmem_limit_bytes=vmem_limit_bytes,
        ),
        cost_estimate=pl.CostEstimate(
            flops=n, transcendentals=n, bytes_accessed=2 * n * itemsize
        ),
        **kwargs,
    )(x2d)

    if fast_path:
        return out2d.reshape(orig_shape)
    return out2d.reshape(-1)[:n].reshape(orig_shape)


if __name__ == "__main__":
    key = jax.random.PRNGKey(0)

    # NCHW-style input consistent with typical usage in the field network.
    x = jax.random.normal(key, (2, 4, 16, 16), dtype=jnp.float32) * 4.0
    y = jax.block_until_ready(exp_activation(x, max_light=5.0))
    y_ref = jnp.exp(jnp.minimum(x, 5.0))
    assert y.shape == x.shape and y.dtype == x.dtype
    assert jnp.allclose(y, y_ref, rtol=1e-6, atol=1e-6), "f32 mismatch vs reference"

    # bf16 path (16-sublane tiling).
    xb = x.astype(jnp.bfloat16)
    yb = jax.block_until_ready(exp_activation(xb, max_light=5.0))
    yb_ref = jnp.exp(jnp.minimum(xb, jnp.bfloat16(5.0)))
    assert yb.dtype == jnp.bfloat16
    assert jnp.allclose(yb.astype(jnp.float32), yb_ref.astype(jnp.float32),
                        rtol=2e-2, atol=2e-2), "bf16 mismatch vs reference"

    # Ragged-size fallback path (size not a multiple of 128).
    xr = jax.random.normal(jax.random.PRNGKey(1), (3, 5, 7), dtype=jnp.float32) * 4.0
    yr = jax.block_until_ready(exp_activation(xr, max_light=5.0))
    yr_ref = jnp.exp(jnp.minimum(xr, 5.0))
    assert yr.shape == xr.shape
    assert jnp.allclose(yr, yr_ref, rtol=1e-6, atol=1e-6), "ragged mismatch vs reference"

    print("KERNEL_OK")
</pallas_src>

<mosaic_0001>
module attributes {stable_mosaic.version = 11 : i64} {
  func.func @_exp_clamp_kernel(%arg0: i32, %arg1: memref<16x128xf32, #tpu.memory_space<vmem>>, %arg2: memref<16x128xf32, #tpu.memory_space<vmem>>) attributes {dimension_semantics = [#tpu.dimension_semantics<parallel>], iteration_bounds = array<i64: 1>, scalar_prefetch = 0 : i64, scratch_operands = 0 : i64, tpu.core_type = #tpu.core_type<tc>, window_params = [{transform_indices = @transform_0, window_bounds = array<i64: 16, 128>}, {transform_indices = @transform_1, window_bounds = array<i64: 16, 128>}]} {
    %c0 = arith.constant 0 : index
    %c0_0 = arith.constant 0 : index
    %0 = vector.load %arg1[%c0, %c0_0] : memref<16x128xf32, #tpu.memory_space<vmem>>, vector<16x128xf32>
    %cst = arith.constant 5.000000e+00 : f32
    %1 = vector.broadcast %cst : f32 to vector<16x128xf32>
    %2 = arith.minimumf %0, %1 : vector<16x128xf32>
    %3 = math.exp %2 : vector<16x128xf32>
    %c0_1 = arith.constant 0 : index
    %c0_2 = arith.constant 0 : index
    %4 = vector.load %arg2[%c0_1, %c0_2] : memref<16x128xf32, #tpu.memory_space<vmem>>, vector<16x128xf32>
    tpu.vector_store %arg2[%c0_1, %c0_2], %3 {strides = array<i32>} : memref<16x128xf32, #tpu.memory_space<vmem>>, vector<16x128xf32>,
    return
  }
  func.func @transform_0(%arg0: i32) -> (i32, i32) {
    %c0_i32 = arith.constant 0 : i32
    %c0_i32_0 = arith.constant 0 : i32
    return %arg0, %c0_i32 : i32, i32
  }
  func.func @transform_1(%arg0: i32) -> (i32, i32) {
    %c0_i32 = arith.constant 0 : i32
    %c0_i32_0 = arith.constant 0 : i32
    return %arg0, %c0_i32 : i32, i32
  }
}

</mosaic_0001>

<bundles_post_ra>
// kernel: tpu_custom_call.1
= control target key start
LH: loop header
LB: loop body
LE: loop exit
PB: predicated region body
PF: predicated region fallthrough
CT: control target
= control target key end

     0   :  { %6 = vsyncpa [#allocation3], 0  ;;  %s150_s0 = inlined_call_operand.hbm [shape: f32[16,128], index: 0, kind: input, shape index: {}]   ;;  %s151_s1 = inlined_call_operand.hbm [shape: f32[16,128], index: 1, kind: output, shape index: {}]  }
   0x1   :  { %7 = vsyncpa [#allocation4], 0  ;;  %s106_s6 = smov [#allocation2]   ;;  %s58_s10 = scalar_lea.hbm %s150_s0, 256 }
   0x2   :  { %s13_s7 = sshll.u32 %s106_s6, 4  ;;  %p59_p0 = scmp.ne.s32.totalorder %s150_s0, %s58_s10  ;;  %s14_s7 = int_to_ptr.vmem [resolvable:$true] %s13_s7 }
   0x3   :  { %p62_p1 = scmp.lt.u32.totalorder %s58_s10, %s150_s0 }
   0x5   :  { %p64_p2 = pnand %p62_p1, %p59_p0 }
   0x7   :  { %67 = shalt.err (!%p64_p2)
}
   0x8   :  { %s68_s15 = scalar_lea.vmem %s14_s7, 256  ;;  %p73_p4 = scmp.lt.s32.totalorder %s14_s7, %s14_s7 }
   0x9   :  { %p69_p3 = scmp.ne.s32.totalorder %s14_s7, %s68_s15  ;;  %p74_p5 = scmp.lt.s32.totalorder %s68_s15, %s68_s15 }
   0xb   :  { %p75_p6 = por %p74_p5, %p73_p4 }
   0xd   :  { %p76_p7 = pnand %p75_p6, %p69_p3 }
   0xf   :  { %79 = shalt.err (!%p76_p7)
}
  0x10   :  { %s107_s16 = smov 128   ;;  %s108_s17 = smov 8  }
  0x11   :  { %19 = dma.hbm_to_vmem [thread:$0]  %s150_s0, 256, %s14_s7, [#allocation3], %s107_s16, %s107_s16, %s108_s17  }
  0x12   :  { %102 = dma.done.wait [#allocation3], 256  }
  0x13   :  { %103 = vsyncadd [#allocation3], 4294967040  ;;  %v23_v0 = vld [vmem:[#allocation2] sm:$0xff]  ;;  %v24_v1 = vld [vmem:[#allocation2 + $0x8] sm:$0xff]  ;;  %s109_s20 = smov [#allocation5]  }
  0x14   :  { %v25_v2 = vmin.f32 %v23_v0, 5.0  ;;  %v26_v3 = vmin.f32 %v24_v1, 5.0  ;;  %s38_s21 = sshll.u32 %s109_s20, 4  ;;  %s39_s21 = int_to_ptr.vmem [resolvable:$true] %s38_s21 }
  0x15   :  { %s80_s22 = scalar_lea.vmem %s39_s21, 256  ;;  %p85_p9 = scmp.lt.s32.totalorder %s39_s21, %s39_s21 }
  0x16   :  { %v27_v4 = vmul.f32 1.442695, %v25_v2  ;;  %v29_v5 = vmul.f32 1.442695, %v26_v3  ;;  %p81_p8 = scmp.ne.s32.totalorder %s39_s21, %s80_s22  ;;  %p86_p10 = scmp.lt.s32.totalorder %s80_s22, %s80_s22 }
  0x18   :  { %54 = vpow2.f32 %v27_v4  ;;  %p87_p11 = por %p86_p10, %p85_p9 }
  0x19   :  { %56 = vpow2.f32 %v29_v5 }
  0x1a   :  { %p88_p12 = pnand %p87_p11, %p81_p8 }
  0x22   :  { %v55_v6 = vpop.eup %54 }
  0x23   :  { %v57_v7 = vpop.eup %56  ;;  %31 = vst [vmem:[#allocation5] sm:$0xff] %v55_v6 }
  0x24   :  { %32 = vst [vmem:[#allocation5 + $0x8] sm:$0xff] %v57_v7 }
  0x25   :  { %91 = shalt.err (!%p88_p12)
}
  0x26   :  { %s92_s24 = scalar_lea.hbm %s151_s1, 256 }
  0x27   :  { %p93_p13 = scmp.ne.s32.totalorder %s151_s1, %s92_s24  ;;  %p96_p0 = scmp.lt.u32.totalorder %s92_s24, %s151_s1 }
  0x29   :  { %p98_p1 = pnand %p96_p0, %p93_p13 }
  0x2b   :  { %101 = shalt.err (!%p98_p1)
}
  0x2c   :  { %44 = dma.vmem_to_hbm [thread:$0]  %s39_s21, 256, %s151_s1, [#allocation4], %s107_s16, %s107_s16, %s108_s17  }
  0x2d   :  { %104 = dma.done.wait [#allocation4], 256  }
  0x2e   :  { %105 = vsyncadd [#allocation4], 4294967040 }
  0x2f   :  { %48 = vsyncpa [#allocation3], 1 }
  0x30   :  { %49 = vsyncpa [#allocation4], 1 }

</bundles_post_ra>
